<compile_context>
chip_gen: v6e
topology: v6e:2x2x1
jax: 0.10.0
libtpu: 0.0.40
codegen_flags: <defaults>
</compile_context>

<pallas_src>
from functools import partial

import jax
import jax.numpy as jnp
import numpy as np
from jax.experimental import pallas as pl
from jax.experimental.pallas import tpu as pltpu


def _make_ctc_kernel(blank: int, num_labels: int):
    def kernel(em_ref, out_ref):
        # (tt, L) f32 tile -> (L, tt): labels on sublanes, time on lanes.
        # Everything downstream is lane-dense; the output row is already lane-major.
        e = pltpu.einshape("tl->lt", em_ref[...])

        # Exact argmax over labels with first-occurrence tie-break (two reductions):
        #   m   = column-wise max, idx = smallest label index attaining it.
        m = jnp.max(e, axis=0, keepdims=True)                        # (1, tt)
        lab = jax.lax.broadcasted_iota(jnp.int32, e.shape, 0)        # (L, tt)
        idx = jnp.min(jnp.where(e == m, lab, num_labels),
                      axis=0, keepdims=True)                         # (1, tt) int32

        # unique_consecutive within the tile: keep t iff idx[t] != idx[t-1], then drop
        # blanks.  The circular wrap puts idx[tt-1] at lane 0, which is wrong there, but
        # lane 0 of every tile (the tile-boundary timestep) is overwritten by the
        # wrapper's fix-up, so no in-kernel splice / position iota is needed.
        prev = pltpu.roll(idx, shift=1, axis=1)
        keep = jnp.logical_and(idx != prev, idx != blank)

        out_ref[...] = jnp.where(keep, idx, -1)                      # merged lane-dense row

    return kernel


@partial(jax.jit, static_argnames=("blank", "seq_tile"))
def greedy_ctc_decode(emission: jax.Array, blank: int = 0, seq_tile: int = 8192):
    """Merged greedy-CTC row.

    Returns a (1, T_pad) int32 row; entry t is the argmax label index if timestep t
    survives unique_consecutive + blank removal, else -1.  Only [:, :T] is meaningful.
    """
    T, L = emission.shape
    assert seq_tile % 128 == 0, "seq_tile must be a multiple of 128 (lane width)"

    tt = min(seq_tile, pl.cdiv(T, 128) * 128)      # lane-aligned time tile
    t_pad = pl.cdiv(T, tt) * tt
    n_tiles = t_pad // tt
    em_pad = jnp.pad(emission, ((0, t_pad - T), (0, 0))) if t_pad != T else emission

    merged = pl.pallas_call(
        _make_ctc_kernel(blank, L),
        out_shape=jax.ShapeDtypeStruct((1, t_pad), jnp.int32),
        grid=(n_tiles,),
        in_specs=[pl.BlockSpec((tt, L), lambda i: (i, 0))],
        out_specs=pl.BlockSpec((1, tt), lambda i: (0, i)),
        compiler_params=pltpu.CompilerParams(
            dimension_semantics=("parallel",),       # no cross-tile carry -> megacore-able
            vmem_limit_bytes=32 * 1024 * 1024,       # tt=8192 uses only a few MiB
        ),
    )(em_pad)

    # Tile-boundary fix-up (tiny XLA ops fused in the same jit): for each tile start
    # position p = i*tt, recompute keep(p) exactly against the true previous timestep
    # (or -1 for the global start) and overwrite the kernel's lane-0 value.
    first_idx = jnp.argmax(em_pad[0::tt], axis=-1).astype(jnp.int32)          # (n_tiles,)
    if n_tiles > 1:
        prev_idx = jnp.concatenate([
            jnp.full((1,), -1, dtype=jnp.int32),
            jnp.argmax(em_pad[tt - 1::tt][: n_tiles - 1], axis=-1).astype(jnp.int32),
        ])
    else:
        prev_idx = jnp.full((1,), -1, dtype=jnp.int32)
    fixed = jnp.where((first_idx != prev_idx) & (first_idx != blank), first_idx, -1)

    merged = merged.reshape(n_tiles, tt).at[:, 0].set(fixed).reshape(1, t_pad)
    return merged


class GreedyCTCDecoder:
    """JAX/Pallas port of the PyTorch GreedyCTCDecoder."""

    def __init__(self, labels, blank: int = 0, seq_tile: int = 8192):
        self.labels = labels
        self._labels_np = np.asarray(labels)
        self.blank = blank
        self.seq_tile = seq_tile

    def __call__(self, emission: jax.Array) -> str:
        T = emission.shape[0]
        merged = greedy_ctc_decode(emission, blank=self.blank, seq_tile=self.seq_tile)
        merged = jax.block_until_ready(merged)
        row = np.asarray(merged)[0, :T]            # single device->host transfer
        kept = row[row >= 0]                       # vectorized keep-filter
        if kept.size == 0:
            return ""
        return "".join(self._labels_np[kept].tolist())   # vectorized label gather + join


def _reference_decode(emission_np: np.ndarray, labels, blank: int = 0) -> str:
    """Pure-numpy reference of the PyTorch semantics."""
    indices = np.argmax(emission_np, axis=-1)
    dedup = [indices[0]] + [indices[t] for t in range(1, len(indices))
                            if indices[t] != indices[t - 1]]
    return "".join(labels[int(i)] for i in dedup if int(i) != blank)


if __name__ == "__main__":
    # Character-level CTC vocabulary (blank at index 0), num_label = 32.
    labels = ["-"] + [chr(ord("a") + i) for i in range(26)] + ["'", " ", ".", ",", "?"]
    assert len(labels) == 32

    # emission: [num_seq, num_label]
    T, L = 256, 32
    key = jax.random.PRNGKey(0)
    emission = jax.random.normal(key, (T, L), dtype=jnp.float32)
    # Craft consecutive duplicates straddling the seq_tile=128 tile boundary and a couple
    # of blank-dominant frames so the dedup / blank / cross-tile fix-up paths are hit.
    emission = emission.at[127].set(emission[126])
    emission = emission.at[128].set(emission[126])
    emission = emission.at[129].set(emission[126])
    emission = emission.at[5, 0].add(20.0)
    emission = emission.at[6, 0].add(20.0)

    ref = _reference_decode(np.asarray(emission), labels, blank=0)

    # Multi-tile path (2 tiles of 128) exercising the parallel grid + boundary fix-up.
    out_multi = GreedyCTCDecoder(labels, blank=0, seq_tile=128)(emission)
    assert out_multi == ref, (out_multi, ref)

    # Single-tile path with the default (large) tile size.
    out_single = GreedyCTCDecoder(labels, blank=0)(emission)
    assert out_single == ref, (out_single, ref)

    # Ragged length (T not a multiple of the tile) -> padding path.
    em2 = emission[:200]
    ref2 = _reference_decode(np.asarray(em2), labels, blank=0)
    out2 = GreedyCTCDecoder(labels, blank=0, seq_tile=128)(em2)
    assert out2 == ref2, (out2, ref2)

    print("KERNEL_OK")
</pallas_src>

<mosaic_0001>
module attributes {stable_mosaic.version = 11 : i64} {
  func.func @kernel(%arg0: i32, %arg1: memref<128x32xf32, #tpu.memory_space<vmem>>, %arg2: memref<1x128xi32, #tpu.memory_space<vmem>>) attributes {dimension_semantics = [#tpu.dimension_semantics<parallel>], iteration_bounds = array<i64: 2>, scalar_prefetch = 0 : i64, scratch_operands = 0 : i64, tpu.core_type = #tpu.core_type<tc>, window_params = [{transform_indices = @transform_0, window_bounds = array<i64: 128, 32>}, {transform_indices = @transform_1, window_bounds = array<i64: 1, 128>}]} {
    %c0 = arith.constant 0 : index
    %c0_0 = arith.constant 0 : index
    %0 = vector.load %arg1[%c0, %c0_0] : memref<128x32xf32, #tpu.memory_space<vmem>>, vector<128x32xf32>
    %1 = tpu.transpose %0, [1, 0] : vector<128x32xf32> -> vector<32x128xf32>
    %cst = arith.constant dense<0xFF800000> : vector<128xf32>
    %2 = vector.multi_reduction <maximumf>, %1, %cst [0] : vector<32x128xf32> to vector<128xf32>
    %3 = vector.shape_cast %2 : vector<128xf32> to vector<1x128xf32>
    %4 = tpu.iota {dimensions = array<i32: 0>} : vector<32x128xi32>
    %5 = vector.broadcast %3 : vector<1x128xf32> to vector<32x128xf32>
    %6 = arith.cmpf oeq, %1, %5 : vector<32x128xf32>
    %c32_i32 = arith.constant 32 : i32
    %7 = vector.broadcast %c32_i32 : i32 to vector<32x128xi32>
    %8 = arith.select %6, %4, %7 : vector<32x128xi1>, vector<32x128xi32>
    %cst_1 = arith.constant dense<2147483647> : vector<128xi32>
    %9 = vector.multi_reduction <minsi>, %8, %cst_1 [0] : vector<32x128xi32> to vector<128xi32>
    %10 = vector.shape_cast %9 : vector<128xi32> to vector<1x128xi32>
    %c1_i32 = arith.constant 1 : i32
    %11 = tpu.dynamic_rotate %10 by %c1_i32 dim 1 : vector<1x128xi32>, i32 -> vector<1x128xi32>
    %12 = arith.cmpi ne, %10, %11 : vector<1x128xi32>
    %c0_i32 = arith.constant 0 : i32
    %13 = vector.broadcast %c0_i32 : i32 to vector<1x128xi32>
    %14 = arith.cmpi ne, %10, %13 : vector<1x128xi32>
    %15 = arith.andi %12, %14 : vector<1x128xi1>
    %c-1_i32 = arith.constant -1 : i32
    %16 = vector.broadcast %c-1_i32 : i32 to vector<1x128xi32>
    %17 = arith.select %15, %10, %16 : vector<1x128xi1>, vector<1x128xi32>
    %c0_2 = arith.constant 0 : index
    %c0_3 = arith.constant 0 : index
    %18 = vector.load %arg2[%c0_2, %c0_3] : memref<1x128xi32, #tpu.memory_space<vmem>>, vector<1x128xi32>
    tpu.vector_store %arg2[%c0_2, %c0_3], %17 {strides = array<i32>} : memref<1x128xi32, #tpu.memory_space<vmem>>, vector<1x128xi32>,
    return
  }
  func.func @transform_0(%arg0: i32) -> (i32, i32) {
    %c0_i32 = arith.constant 0 : i32
    %c0_i32_0 = arith.constant 0 : i32
    return %arg0, %c0_i32 : i32, i32
  }
  func.func @transform_1(%arg0: i32) -> (i32, i32) {
    %c0_i32 = arith.constant 0 : i32
    %c0_i32_0 = arith.constant 0 : i32
    return %c0_i32, %arg0 : i32, i32
  }
}

</mosaic_0001>

<bundles_post_ra>
// kernel: greedy_ctc_decode.1
= control target key start
LH: loop header
LB: loop body
LE: loop exit
PB: predicated region body
PF: predicated region fallthrough
CT: control target
= control target key end

     0   :  { %s291_s6 = smov 0   ;;  %s331_s0 = inlined_call_operand.vmem [shape: f32[256,32], index: 0, kind: input, shape index: {}]   ;;  %s332_s1 = inlined_call_operand.vmem [shape: s32[1,256], index: 1, kind: output, shape index: {}]  }
   0x1 LB: > { %s297_s7 = sadd.s32 4294967295, %s278_s6   ;;  %p258_p0 = scmp.ge.s32.totalorder %s278_s6, 1  ;;  %s278_s6 = sphi %s291_s6, %s11_s6  }
   0x2   : > { %p88_p1 = scmp.lt.s32.totalorder %s278_s6, 3 }
   0x4   : > { %p89_p2 = pnand %p258_p0, %p88_p1 }
   0x5   : > { %s259_s8 = sshll.u32 (!%p89_p2), %s297_s7, 4  ;;  %s280_s13 = smov (!%p89_p2), 1  }
   0x6   : > { %92 = sbr.rel (%p89_p2) target bundleno = 305 (0x131), region = 24  ;;  %p107_p3 = scmp.lt.s32.totalorder (!%p89_p2), %s259_s8, 31 }
   0x7   : > { %p112_p4 = scmp.lt.s32.totalorder (!%p89_p2), %s297_s7, 1 }
   0xb   : > { %s334_s8 = smov (!%p107_p3, %s259_s8), 31  ;;  %v172_v24 = vlaneseq  ;;  %s336_s7 = smov (!%p112_p4, %s297_s7), 1 }
   0xc   : > { %s260_s9 = sshll.u32 %s334_s8, 3  ;;  %s114_s16 = scalar_lea.vmem %s332_s1, %s336_s7 }
   0xd   : > { %s305_s12 = scalar_lea.vmem %s331_s0, %s260_s9  ;;  %v173_v27 = vshrl.u32 %v172_v24, 7 }
   0xe   : > { %v115_v0 = vld [vmem:[%s305_s12] sm:$0xff]  ;;  %v116_v1 = vld [vmem:[%s305_s12 + $0x8] sm:$0xff]  ;;  %v117_v2 = vld [vmem:[%s305_s12 + $0x10] sm:$0xff] }
   0xf   : > { %131 = vxpose.xlu0.b32.start [1/16] (narrow) %v115_v0, 32  ;;  %v118_v3 = vld [vmem:[%s305_s12 + $0x18] sm:$0xff]  ;;  %v119_v4 = vld [vmem:[%s305_s12 + $0x20] sm:$0xff]  ;;  %v120_v5 = vld [vmem:[%s305_s12 + $0x28] sm:$0xff]  ;;  %v174_v30 = vadd.s32 8, %v173_v27  ;;  %v175_v31 = vadd.s32 16, %v173_v27 }
  0x10   : > { %v121_v6 = vld [vmem:[%s305_s12 + $0x30] sm:$0xff]  ;;  %v122_v7 = vld [vmem:[%s305_s12 + $0x38] sm:$0xff]  ;;  %v123_v8 = vld [vmem:[%s305_s12 + $0x40] sm:$0xff]  ;;  %v176_v32 = vadd.s32 24, %v173_v27 }
  0x11   : > { %v124_v9 = vld [vmem:[%s305_s12 + $0x48] sm:$0xff]  ;;  %v125_v10 = vld [vmem:[%s305_s12 + $0x50] sm:$0xff]  ;;  %v126_v11 = vld [vmem:[%s305_s12 + $0x58] sm:$0xff] }
  0x12   : > { %v127_v12 = vld [vmem:[%s305_s12 + $0x60] sm:$0xff]  ;;  %v128_v13 = vld [vmem:[%s305_s12 + $0x68] sm:$0xff]  ;;  %v129_v14 = vld [vmem:[%s305_s12 + $0x70] sm:$0xff] }
  0x13   : > { %132 = vxpose.xlu0.b32.cont [2/16] (narrow) %v116_v1, 32  ;;  %v130_v15 = vld [vmem:[%s305_s12 + $0x78] sm:$0xff] }
  0x17   : > { %133 = vxpose.xlu0.b32.cont [3/16] (narrow) %v117_v2, 32 }
  0x1b   : > { %134 = vxpose.xlu0.b32.cont [4/16] (narrow) %v118_v3, 32 }
  0x1f   : > { %135 = vxpose.xlu0.b32.cont [5/16] (narrow) %v119_v4, 32 }
  0x23   : > { %136 = vxpose.xlu0.b32.cont [6/16] (narrow) %v120_v5, 32 }
  0x27   : > { %137 = vxpose.xlu0.b32.cont [7/16] (narrow) %v121_v6, 32 }
  0x2b   : > { %138 = vxpose.xlu0.b32.cont [8/16] (narrow) %v122_v7, 32 }
  0x2f   : > { %139 = vxpose.xlu0.b32.cont [9/16] (narrow) %v123_v8, 32 }
  0x33   : > { %140 = vxpose.xlu0.b32.cont [10/16] (narrow) %v124_v9, 32 }
  0x37   : > { %141 = vxpose.xlu0.b32.cont [11/16] (narrow) %v125_v10, 32 }
  0x3b   : > { %142 = vxpose.xlu0.b32.cont [12/16] (narrow) %v126_v11, 32 }
  0x3f   : > { %143 = vxpose.xlu0.b32.cont [13/16] (narrow) %v127_v12, 32 }
  0x43   : > { %144 = vxpose.xlu0.b32.cont [14/16] (narrow) %v128_v13, 32 }
  0x47   : > { %145 = vxpose.xlu0.b32.cont [15/16] (narrow) %v129_v14, 32 }
  0x4b   : > { %146 = vxpose.xlu0.b32.end [16/16] (narrow) %v130_v15, 32 }
  0x8b   : > { %v147_v16 = vpop.trf.xlu0 }
  0x8f   : > { %v148_v17 = vpop.trf.xlu0 }
  0x90   : > { %v163_v20 = vmax.f32 %v147_v16, %v148_v17 }
  0x93   : > { %v149_v18 = vpop.trf.xlu0 }
  0x97   : > { %v150_v19 = vpop.trf.xlu0 }
  0x98   : > { %v164_v21 = vmax.f32 %v149_v18, %v150_v19 }
  0x9a   : > { %v165_v22 = vmax.f32 %v163_v20, %v164_v21 }
  0x9c   : > { %v166_v23 = vrot.slane %v165_v22, 4 }
  0x9e   : > { %v167_v25 = vmax.f32 %v165_v22, %v166_v23 }
  0xa0   : > { %v168_v26 = vrot.slane %v167_v25, 2 }
  0xa2   : > { %v169_v28 = vmax.f32 %v167_v25, %v168_v26 }
  0xa4   : > { %v170_v29 = vrot.slane %v169_v28, 1 }
  0xa6   : > { %v171_v33 = vmax.f32 %v169_v28, %v170_v29 }
  0xa8   : > { %vm177_vm0 = vcmp.eq.f32.partialorder %v147_v16, %v171_v33  ;;  %vm178_vm1 = vcmp.eq.f32.partialorder %v148_v17, %v171_v33  ;;  %vm179_vm2 = vcmp.eq.f32.partialorder %v149_v18, %v171_v33  ;;  %vm180_vm3 = vcmp.eq.f32.partialorder %v150_v19, %v171_v33 }
  0xa9   : > { %v181_v34 = vsel %vm177_vm0, %v173_v27, 32  ;;  %v182_v35 = vsel %vm178_vm1, %v174_v30, 32  ;;  %v183_v36 = vsel %vm179_vm2, %v175_v31, 32  ;;  %v184_v37 = vsel %vm180_vm3, %v176_v32, 32 }
  0xaa   : > { %vm185_vm4 = vcmp.lt.s32.totalorder %v181_v34, %v182_v35  ;;  %vm187_vm5 = vcmp.lt.s32.totalorder %v183_v36, %v184_v37 }
  0xab   : > { %v186_v38 = vsel %vm185_vm4, %v181_v34, %v182_v35  ;;  %v188_v39 = vsel %vm187_vm5, %v183_v36, %v184_v37 }
  0xac   : > { %vm189_vm6 = vcmp.lt.s32.totalorder %v186_v38, %v188_v39 }
  0xad   : > { %v190_v40 = vsel %vm189_vm6, %v186_v38, %v188_v39 }
  0xae   : > { %v191_v41 = vrot.slane %v190_v40, 4 }
  0xb0   : > { %vm192_vm7 = vcmp.lt.s32.totalorder %v190_v40, %v191_v41 }
  0xb1   : > { %v193_v42 = vsel %vm192_vm7, %v190_v40, %v191_v41 }
  0xb2   : > { %v194_v43 = vrot.slane %v193_v42, 2 }
  0xb4   : > { %vm195_vm8 = vcmp.lt.s32.totalorder %v193_v42, %v194_v43 }
  0xb5   : > { %v196_v44 = vsel %vm195_vm8, %v193_v42, %v194_v43 }
  0xb6   : > { %v197_v45 = vrot.slane %v196_v44, 1 }
  0xb8   : > { %vm198_vm9 = vcmp.lt.s32.totalorder %v196_v44, %v197_v45 }
  0xb9   : > { %v199_v46 = vsel %vm198_vm9, %v196_v44, %v197_v45 }
  0xba   : > { %200 = vrot.lane.b32.xlu1 %v199_v46, %s280_s13  ;;  %vm203_vm11 = vcmp.ne.s32.totalorder %v199_v46, 0 }
 0x12c   : > { %v201_v47 = vpop.permute.xlu1 %200 }
 0x12d   : > { %vm202_vm10 = vcmp.ne.s32.totalorder %v199_v46, %v201_v47 }
 0x12e   : > { %vm204_vm12 = vmand %vm202_vm10, %vm203_vm11 }
 0x12f   : > { %v205_v48 = vsel %vm204_vm12, %v199_v46, 4294967295 }
 0x130   : > { %206 = vst [vmem:[%s114_s16] sm:$0x1] %v205_v48 }
 0x131 PF: > { %s11_s6 = sadd.s32 1, %s278_s6  }
 0x132   : > { %p8_p5 = scmp.ge.s32.totalorder %s11_s6, 4  }
 0x134   :  { %10 = sbr.rel (!%p8_p5) target bundleno = 1 (0x1), region = 54 }

</bundles_post_ra>
